<compile_context>
chip_gen: v5e
topology: v5e:2x2
jax: 0.10.0
libtpu: 0.0.40
codegen_flags: <defaults>
</compile_context>

<pallas_src>
import functools

import numpy as np
import jax
import jax.numpy as jnp
from jax.experimental import pallas as pl
from jax.experimental.pallas import tpu as pltpu

_PI = float(np.pi)


def _cdiv(a, b):
    return -(-a // b)


def _make_kernel(N, K, tr):
    """Build the per-tile kernel.  N modes, K valid points, tr sublane rows."""

    def kernel(w_ref, x_ref, fdf_ref, colmin_ref):
        x = x_ref[...]                      # (tr, 128) f32, fully dense vregs
        theta = _PI * x
        s1 = jnp.sin(theta)                 # EUP: the only 2 transcendentals
        c1 = jnp.cos(theta)                 #      per point, independent of N

        # Mode n = 1.
        s_n, c_n = s1, c1
        y_n = _PI * c_n
        w0 = w_ref[0]                       # scalar from SMEM
        f = x + w0 * s_n
        df = 1.0 + w0 * y_n
        ymin = y_n

        # Modes n = 2 .. N via angle-addition recurrence (pure VALU work).
        for n in range(2, N + 1):
            s_next = s1 * c_n + c1 * s_n
            c_next = c1 * c_n - s1 * s_n
            s_n, c_n = s_next, c_next
            y_n = (_PI * n) * c_n
            wn = w_ref[n - 1]
            f = f + wn * s_n
            df = df + wn * y_n
            ymin = jnp.minimum(ymin, y_n)

        # Packed output: row 0 = f, row 1 = df (one output DMA stream).
        fdf_ref[0, :, :] = f
        fdf_ref[1, :, :] = df

        # Per-tile min(y): mask padded point slots (global index >= K) with
        # +inf, reduce over sublanes, store one small (8, 128) block per step.
        row = jax.lax.broadcasted_iota(jnp.int32, (tr, 128), 0)
        col = jax.lax.broadcasted_iota(jnp.int32, (tr, 128), 1)
        gidx = (pl.program_id(0) * tr + row) * 128 + col
        ymin = jnp.where(gidx < K, ymin, jnp.inf)
        m = jnp.min(ymin, axis=0, keepdims=True)          # (1, 128)
        colmin_ref[...] = jnp.broadcast_to(m, (8, 128))

    return kernel


@functools.partial(jax.jit, static_argnames=("N", "K", "tr", "nsteps"))
def _fourier_forward_impl(xflat, w, *, N, K, tr, nsteps):
    """xflat: (K,) f32 points.  w: (N,) f32 weights.  Returns (f, df, ymin)."""
    R = nsteps * tr
    Kpad = R * 128

    xr = jnp.pad(xflat, (0, Kpad - K)).reshape(R, 128)    # dense (rows, lanes)

    fdf, colmin = pl.pallas_call(
        _make_kernel(N, K, tr),
        out_shape=(
            jax.ShapeDtypeStruct((2, R, 128), jnp.float32),       # [f; df]
            jax.ShapeDtypeStruct((nsteps * 8, 128), jnp.float32),  # per-step min
        ),
        grid_spec=pltpu.PrefetchScalarGridSpec(
            num_scalar_prefetch=1,            # weights -> SMEM scalars
            grid=(nsteps,),
            in_specs=[
                pl.BlockSpec((tr, 128), lambda i, w: (i, 0)),      # x tile
            ],
            out_specs=[
                pl.BlockSpec((2, tr, 128), lambda i, w: (0, i, 0)),  # f/df tile
                pl.BlockSpec((8, 128), lambda i, w: (i, 0)),         # tile min
            ],
        ),
        compiler_params=pltpu.CompilerParams(
            dimension_semantics=("parallel",),   # steps independent; v7x megacore
        ),
    )(w, xr)

    f = fdf[0].reshape(Kpad)[:K].reshape(K, 1)
    df = fdf[1].reshape(Kpad)[:K].reshape(K, 1)
    ymin = jnp.min(colmin)
    return f, df, ymin


def fourier_forward(x, w, *, max_rows_per_step=512):
    """x: (K, 1) or (K,) points.  w: (N,) weights.

    Returns (f, df, ymin) with f, df of shape (K, 1) and ymin a device scalar
    equal to min over valid (point, mode) entries of y = pi*n*cos(pi*n*x).

    A single grid step handles up to max_rows_per_step*128 points (default
    65536), so small/medium K (e.g. the module default K=1024) runs in one
    step on every TPU generation; larger K splits into big, balanced steps
    that v7x's two TensorCores can share.
    """
    xflat = jnp.asarray(x, jnp.float32).reshape(-1)
    K = int(xflat.shape[0])
    N = int(w.shape[0])
    assert N >= 1 and K >= 1

    rows_needed = _cdiv(K, 128)
    nsteps = _cdiv(rows_needed, max_rows_per_step)
    tr = _cdiv(_cdiv(rows_needed, nsteps), 8) * 8   # rows per step, multiple of 8

    return _fourier_forward_impl(
        xflat, jnp.asarray(w, jnp.float32), N=N, K=K, tr=tr, nsteps=nsteps
    )


class FourierLayerPallas:
    """JAX/Pallas port of the PyTorch FourierLayer."""

    def __init__(self, N, init_scale=0.0, *, key=None):
        self.N = N
        if key is None:
            key = jax.random.PRNGKey(0)
        # torch.nn.Parameter(init_scale * randn(N, 1)) -> deterministic init here.
        self.w = (init_scale * jax.random.normal(key, (N,))).astype(jnp.float32)
        self.ymin = None
        self.K = None
        self.find_ymin()
        self.project()

    def forward(self, x):
        f, df, ymin = fourier_forward(x, self.w)
        # Matches torch forward: self.ymin = min(y).  Kept as a device scalar
        # (no per-call host sync); project() pulls it to the host.
        self.ymin = ymin
        return f, df

    def find_ymin(self, npoints=1024):
        x = jnp.linspace(0.0, 1.0, npoints, dtype=jnp.float32).reshape(-1, 1)
        self.K = npoints
        _, df = self.forward(x)
        # Matches the torch module: ymin is overwritten with min of the SECOND
        # return value (df) here, not the intermediate y matrix.
        self.ymin = jnp.min(df)
        return self.ymin

    def project(self, npoints=1024, epsilon=None, stabilizer=1e-4):
        self.find_ymin(npoints)
        ymin = float(self.ymin)   # single host pull, only at projection time
        if epsilon is None:
            epsilon = stabilizer + float(jnp.sum(jnp.abs(self.w))) * (
                0.5 * self.N * np.pi / npoints
            ) ** 3
        if ymin < epsilon:
            self.w = self.w * (1.0 / (1.0 + epsilon - ymin))
        self.ymin = ymin


def _reference_forward(x, nvec, w):
    """Pure-JAX reference matching the PyTorch math (for a sanity check)."""
    z = np.pi * nvec[None, :] * x            # (K, N)
    y = np.pi * nvec[None, :] * jnp.cos(z)   # (K, N)
    s = jnp.sin(z)
    f = x + jnp.sum(s * w[None, :], axis=1, keepdims=True)
    df = 1.0 + jnp.sum(y * w[None, :], axis=1, keepdims=True)
    return f, df, jnp.min(y)


if __name__ == "__main__":
    key = jax.random.PRNGKey(0)
    k_w1, k_w2, k_w3, k_x1, k_x2, k_x3 = jax.random.split(key, 6)

    # Case 1: N = 8, K = 200 (non-multiple of 128; single grid step).
    N1, K1 = 8, 200
    layer1 = FourierLayerPallas(N1, init_scale=0.1, key=k_w1)
    x1 = jax.random.uniform(k_x1, (K1, 1), dtype=jnp.float32)
    f1, df1 = layer1.forward(x1)
    jax.block_until_ready((f1, df1))

    nvec1 = jnp.arange(1, N1 + 1, dtype=jnp.float32)
    f1_ref, df1_ref, ymin1_ref = _reference_forward(x1, nvec1, layer1.w)
    assert f1.shape == (K1, 1) and df1.shape == (K1, 1)
    assert jnp.allclose(f1, f1_ref, atol=2e-5, rtol=2e-5)
    assert jnp.allclose(df1, df1_ref, atol=2e-5, rtol=2e-5)
    assert abs(float(layer1.ymin) - float(ymin1_ref)) < 2e-4

    # Case 2: N = 5, K = 517 (exercises padded point slots in the min mask).
    N2, K2 = 5, 517
    layer2 = FourierLayerPallas(N2, init_scale=0.05, key=k_w2)
    x2 = jax.random.uniform(k_x2, (K2, 1), dtype=jnp.float32)
    f2, df2 = layer2.forward(x2)
    jax.block_until_ready((f2, df2))

    nvec2 = jnp.arange(1, N2 + 1, dtype=jnp.float32)
    f2_ref, df2_ref, ymin2_ref = _reference_forward(x2, nvec2, layer2.w)
    assert jnp.allclose(f2, f2_ref, atol=2e-5, rtol=2e-5)
    assert jnp.allclose(df2, df2_ref, atol=2e-5, rtol=2e-5)
    assert abs(float(layer2.ymin) - float(ymin2_ref)) < 2e-4

    # Case 3: N = 6, K = 2048 with a small max_rows_per_step to exercise the
    # multi-step grid and the per-step colmin output path.
    N3, K3 = 6, 2048
    w3 = (0.2 * jax.random.normal(k_w3, (N3,))).astype(jnp.float32)
    x3 = jax.random.uniform(k_x3, (K3, 1), dtype=jnp.float32)
    f3, df3, ymin3 = fourier_forward(x3, w3, max_rows_per_step=8)
    jax.block_until_ready((f3, df3, ymin3))

    nvec3 = jnp.arange(1, N3 + 1, dtype=jnp.float32)
    f3_ref, df3_ref, ymin3_ref = _reference_forward(x3, nvec3, w3)
    assert jnp.allclose(f3, f3_ref, atol=2e-5, rtol=2e-5)
    assert jnp.allclose(df3, df3_ref, atol=2e-5, rtol=2e-5)
    assert abs(float(ymin3) - float(ymin3_ref)) < 2e-4

    print("KERNEL_OK")
</pallas_src>

<mosaic_0001>
module attributes {stable_mosaic.version = 11 : i64} {
  func.func @kernel(%arg0: i32, %arg1: memref<8xf32, #tpu.memory_space<smem>>, %arg2: memref<8x128xf32, #tpu.memory_space<vmem>>, %arg3: memref<2x8x128xf32, #tpu.memory_space<vmem>>, %arg4: memref<8x128xf32, #tpu.memory_space<vmem>>) attributes {dimension_semantics = [#tpu.dimension_semantics<parallel>], iteration_bounds = array<i64: 1>, scalar_prefetch = 1 : i64, scratch_operands = 0 : i64, tpu.core_type = #tpu.core_type<tc>, window_params = [{transform_indices = @transform_0, window_bounds = array<i64: 8, 128>}, {transform_indices = @transform_1, window_bounds = array<i64: 2, 8, 128>}, {transform_indices = @transform_2, window_bounds = array<i64: 8, 128>}]} {
    %c0 = arith.constant 0 : index
    %c0_0 = arith.constant 0 : index
    %0 = vector.load %arg2[%c0, %c0_0] : memref<8x128xf32, #tpu.memory_space<vmem>>, vector<8x128xf32>
    %cst = arith.constant 3.14159274 : f32
    %1 = vector.broadcast %cst : f32 to vector<8x128xf32>
    %2 = arith.mulf %1, %0 : vector<8x128xf32>
    %3 = math.sin %2 : vector<8x128xf32>
    %4 = math.cos %2 : vector<8x128xf32>
    %cst_1 = arith.constant 3.14159274 : f32
    %5 = vector.broadcast %cst_1 : f32 to vector<8x128xf32>
    %6 = arith.mulf %5, %4 : vector<8x128xf32>
    %c0_2 = arith.constant 0 : index
    %7 = memref.load %arg1[%c0_2] : memref<8xf32, #tpu.memory_space<smem>>
    %8 = vector.broadcast %7 : f32 to vector<8x128xf32>
    %9 = arith.mulf %8, %3 : vector<8x128xf32>
    %10 = arith.addf %0, %9 : vector<8x128xf32>
    %11 = vector.broadcast %7 : f32 to vector<8x128xf32>
    %12 = arith.mulf %11, %6 : vector<8x128xf32>
    %cst_3 = arith.constant 1.000000e+00 : f32
    %13 = vector.broadcast %cst_3 : f32 to vector<8x128xf32>
    %14 = arith.addf %13, %12 : vector<8x128xf32>
    %15 = arith.mulf %3, %4 : vector<8x128xf32>
    %16 = arith.mulf %4, %3 : vector<8x128xf32>
    %17 = arith.addf %15, %16 : vector<8x128xf32>
    %18 = arith.mulf %4, %4 : vector<8x128xf32>
    %19 = arith.mulf %3, %3 : vector<8x128xf32>
    %20 = arith.subf %18, %19 : vector<8x128xf32>
    %cst_4 = arith.constant 6.28318548 : f32
    %21 = vector.broadcast %cst_4 : f32 to vector<8x128xf32>
    %22 = arith.mulf %21, %20 : vector<8x128xf32>
    %c1 = arith.constant 1 : index
    %23 = memref.load %arg1[%c1] : memref<8xf32, #tpu.memory_space<smem>>
    %24 = vector.broadcast %23 : f32 to vector<8x128xf32>
    %25 = arith.mulf %24, %17 : vector<8x128xf32>
    %26 = arith.addf %10, %25 : vector<8x128xf32>
    %27 = vector.broadcast %23 : f32 to vector<8x128xf32>
    %28 = arith.mulf %27, %22 : vector<8x128xf32>
    %29 = arith.addf %14, %28 : vector<8x128xf32>
    %30 = arith.minimumf %6, %22 : vector<8x128xf32>
    %31 = arith.mulf %3, %20 : vector<8x128xf32>
    %32 = arith.mulf %4, %17 : vector<8x128xf32>
    %33 = arith.addf %31, %32 : vector<8x128xf32>
    %34 = arith.mulf %4, %20 : vector<8x128xf32>
    %35 = arith.mulf %3, %17 : vector<8x128xf32>
    %36 = arith.subf %34, %35 : vector<8x128xf32>
    %cst_5 = arith.constant 9.42477798 : f32
    %37 = vector.broadcast %cst_5 : f32 to vector<8x128xf32>
    %38 = arith.mulf %37, %36 : vector<8x128xf32>
    %c2 = arith.constant 2 : index
    %39 = memref.load %arg1[%c2] : memref<8xf32, #tpu.memory_space<smem>>
    %40 = vector.broadcast %39 : f32 to vector<8x128xf32>
    %41 = arith.mulf %40, %33 : vector<8x128xf32>
    %42 = arith.addf %26, %41 : vector<8x128xf32>
    %43 = vector.broadcast %39 : f32 to vector<8x128xf32>
    %44 = arith.mulf %43, %38 : vector<8x128xf32>
    %45 = arith.addf %29, %44 : vector<8x128xf32>
    %46 = arith.minimumf %30, %38 : vector<8x128xf32>
    %47 = arith.mulf %3, %36 : vector<8x128xf32>
    %48 = arith.mulf %4, %33 : vector<8x128xf32>
    %49 = arith.addf %47, %48 : vector<8x128xf32>
    %50 = arith.mulf %4, %36 : vector<8x128xf32>
    %51 = arith.mulf %3, %33 : vector<8x128xf32>
    %52 = arith.subf %50, %51 : vector<8x128xf32>
    %cst_6 = arith.constant 12.566371 : f32
    %53 = vector.broadcast %cst_6 : f32 to vector<8x128xf32>
    %54 = arith.mulf %53, %52 : vector<8x128xf32>
    %c3 = arith.constant 3 : index
    %55 = memref.load %arg1[%c3] : memref<8xf32, #tpu.memory_space<smem>>
    %56 = vector.broadcast %55 : f32 to vector<8x128xf32>
    %57 = arith.mulf %56, %49 : vector<8x128xf32>
    %58 = arith.addf %42, %57 : vector<8x128xf32>
    %59 = vector.broadcast %55 : f32 to vector<8x128xf32>
    %60 = arith.mulf %59, %54 : vector<8x128xf32>
    %61 = arith.addf %45, %60 : vector<8x128xf32>
    %62 = arith.minimumf %46, %54 : vector<8x128xf32>
    %63 = arith.mulf %3, %52 : vector<8x128xf32>
    %64 = arith.mulf %4, %49 : vector<8x128xf32>
    %65 = arith.addf %63, %64 : vector<8x128xf32>
    %66 = arith.mulf %4, %52 : vector<8x128xf32>
    %67 = arith.mulf %3, %49 : vector<8x128xf32>
    %68 = arith.subf %66, %67 : vector<8x128xf32>
    %cst_7 = arith.constant 15.707963 : f32
    %69 = vector.broadcast %cst_7 : f32 to vector<8x128xf32>
    %70 = arith.mulf %69, %68 : vector<8x128xf32>
    %c4 = arith.constant 4 : index
    %71 = memref.load %arg1[%c4] : memref<8xf32, #tpu.memory_space<smem>>
    %72 = vector.broadcast %71 : f32 to vector<8x128xf32>
    %73 = arith.mulf %72, %65 : vector<8x128xf32>
    %74 = arith.addf %58, %73 : vector<8x128xf32>
    %75 = vector.broadcast %71 : f32 to vector<8x128xf32>
    %76 = arith.mulf %75, %70 : vector<8x128xf32>
    %77 = arith.addf %61, %76 : vector<8x128xf32>
    %78 = arith.minimumf %62, %70 : vector<8x128xf32>
    %79 = arith.mulf %3, %68 : vector<8x128xf32>
    %80 = arith.mulf %4, %65 : vector<8x128xf32>
    %81 = arith.addf %79, %80 : vector<8x128xf32>
    %82 = arith.mulf %4, %68 : vector<8x128xf32>
    %83 = arith.mulf %3, %65 : vector<8x128xf32>
    %84 = arith.subf %82, %83 : vector<8x128xf32>
    %cst_8 = arith.constant 18.849556 : f32
    %85 = vector.broadcast %cst_8 : f32 to vector<8x128xf32>
    %86 = arith.mulf %85, %84 : vector<8x128xf32>
    %c5 = arith.constant 5 : index
    %87 = memref.load %arg1[%c5] : memref<8xf32, #tpu.memory_space<smem>>
    %88 = vector.broadcast %87 : f32 to vector<8x128xf32>
    %89 = arith.mulf %88, %81 : vector<8x128xf32>
    %90 = arith.addf %74, %89 : vector<8x128xf32>
    %91 = vector.broadcast %87 : f32 to vector<8x128xf32>
    %92 = arith.mulf %91, %86 : vector<8x128xf32>
    %93 = arith.addf %77, %92 : vector<8x128xf32>
    %94 = arith.minimumf %78, %86 : vector<8x128xf32>
    %95 = arith.mulf %3, %84 : vector<8x128xf32>
    %96 = arith.mulf %4, %81 : vector<8x128xf32>
    %97 = arith.addf %95, %96 : vector<8x128xf32>
    %98 = arith.mulf %4, %84 : vector<8x128xf32>
    %99 = arith.mulf %3, %81 : vector<8x128xf32>
    %100 = arith.subf %98, %99 : vector<8x128xf32>
    %cst_9 = arith.constant 21.991148 : f32
    %101 = vector.broadcast %cst_9 : f32 to vector<8x128xf32>
    %102 = arith.mulf %101, %100 : vector<8x128xf32>
    %c6 = arith.constant 6 : index
    %103 = memref.load %arg1[%c6] : memref<8xf32, #tpu.memory_space<smem>>
    %104 = vector.broadcast %103 : f32 to vector<8x128xf32>
    %105 = arith.mulf %104, %97 : vector<8x128xf32>
    %106 = arith.addf %90, %105 : vector<8x128xf32>
    %107 = vector.broadcast %103 : f32 to vector<8x128xf32>
    %108 = arith.mulf %107, %102 : vector<8x128xf32>
    %109 = arith.addf %93, %108 : vector<8x128xf32>
    %110 = arith.minimumf %94, %102 : vector<8x128xf32>
    %111 = arith.mulf %3, %100 : vector<8x128xf32>
    %112 = arith.mulf %4, %97 : vector<8x128xf32>
    %113 = arith.addf %111, %112 : vector<8x128xf32>
    %114 = arith.mulf %4, %100 : vector<8x128xf32>
    %115 = arith.mulf %3, %97 : vector<8x128xf32>
    %116 = arith.subf %114, %115 : vector<8x128xf32>
    %cst_10 = arith.constant 25.1327419 : f32
    %117 = vector.broadcast %cst_10 : f32 to vector<8x128xf32>
    %118 = arith.mulf %117, %116 : vector<8x128xf32>
    %c7 = arith.constant 7 : index
    %119 = memref.load %arg1[%c7] : memref<8xf32, #tpu.memory_space<smem>>
    %120 = vector.broadcast %119 : f32 to vector<8x128xf32>
    %121 = arith.mulf %120, %113 : vector<8x128xf32>
    %122 = arith.addf %106, %121 : vector<8x128xf32>
    %123 = vector.broadcast %119 : f32 to vector<8x128xf32>
    %124 = arith.mulf %123, %118 : vector<8x128xf32>
    %125 = arith.addf %109, %124 : vector<8x128xf32>
    %126 = arith.minimumf %110, %118 : vector<8x128xf32>
    %c0_11 = arith.constant 0 : index
    %c0_12 = arith.constant 0 : index
    %c0_13 = arith.constant 0 : index
    %127 = vector.load %arg3[%c0_11, %c0_12, %c0_13] : memref<2x8x128xf32, #tpu.memory_space<vmem>>, vector<1x8x128xf32>
    %128 = vector.shape_cast %127 : vector<1x8x128xf32> to vector<8x128xf32>
    %129 = vector.shape_cast %122 : vector<8x128xf32> to vector<1x8x128xf32>
    tpu.vector_store %arg3[%c0_11, %c0_12, %c0_13], %129 {strides = array<i32>} : memref<2x8x128xf32, #tpu.memory_space<vmem>>, vector<1x8x128xf32>,
    %c1_14 = arith.constant 1 : index
    %c0_15 = arith.constant 0 : index
    %c0_16 = arith.constant 0 : index
    %130 = vector.load %arg3[%c1_14, %c0_15, %c0_16] : memref<2x8x128xf32, #tpu.memory_space<vmem>>, vector<1x8x128xf32>
    %131 = vector.shape_cast %130 : vector<1x8x128xf32> to vector<8x128xf32>
    %132 = vector.shape_cast %125 : vector<8x128xf32> to vector<1x8x128xf32>
    tpu.vector_store %arg3[%c1_14, %c0_15, %c0_16], %132 {strides = array<i32>} : memref<2x8x128xf32, #tpu.memory_space<vmem>>, vector<1x8x128xf32>,
    %133 = tpu.iota {dimensions = array<i32: 0>} : vector<8x128xi32>
    %134 = tpu.iota {dimensions = array<i32: 1>} : vector<8x128xi32>
    %c8_i32 = arith.constant 8 : i32
    %135 = arith.muli %arg0, %c8_i32 : i32
    %136 = vector.broadcast %135 : i32 to vector<8x128xi32>
    %137 = arith.addi %136, %133 : vector<8x128xi32>
    %c128_i32 = arith.constant 128 : i32
    %138 = vector.broadcast %c128_i32 : i32 to vector<8x128xi32>
    %139 = arith.muli %137, %138 : vector<8x128xi32>
    %140 = arith.addi %139, %134 : vector<8x128xi32>
    %c1024_i32 = arith.constant 1024 : i32
    %141 = vector.broadcast %c1024_i32 : i32 to vector<8x128xi32>
    %142 = arith.cmpi slt, %140, %141 : vector<8x128xi32>
    %cst_17 = arith.constant 0x7F800000 : f32
    %143 = vector.broadcast %cst_17 : f32 to vector<8x128xf32>
    %144 = arith.select %142, %126, %143 : vector<8x128xi1>, vector<8x128xf32>
    %cst_18 = arith.constant dense<0x7F800000> : vector<128xf32>
    %145 = vector.multi_reduction <minimumf>, %144, %cst_18 [0] : vector<8x128xf32> to vector<128xf32>
    %146 = vector.shape_cast %145 : vector<128xf32> to vector<1x128xf32>
    %147 = vector.shape_cast %146 : vector<1x128xf32> to vector<1x128xf32>
    %148 = vector.broadcast %147 : vector<1x128xf32> to vector<8x128xf32>
    %c0_19 = arith.constant 0 : index
    %c0_20 = arith.constant 0 : index
    %149 = vector.load %arg4[%c0_19, %c0_20] : memref<8x128xf32, #tpu.memory_space<vmem>>, vector<8x128xf32>
    tpu.vector_store %arg4[%c0_19, %c0_20], %148 {strides = array<i32>} : memref<8x128xf32, #tpu.memory_space<vmem>>, vector<8x128xf32>,
    return
  }
  func.func @transform_0(%arg0: i32, %arg1: memref<8xf32, #tpu.memory_space<smem>>) -> (i32, i32) {
    %c0_i32 = arith.constant 0 : i32
    %c0_i32_0 = arith.constant 0 : i32
    return %arg0, %c0_i32 : i32, i32
  }
  func.func @transform_1(%arg0: i32, %arg1: memref<8xf32, #tpu.memory_space<smem>>) -> (i32, i32, i32) {
    %c0_i32 = arith.constant 0 : i32
    %c0_i32_0 = arith.constant 0 : i32
    %c0_i32_1 = arith.constant 0 : i32
    return %c0_i32, %arg0, %c0_i32_0 : i32, i32, i32
  }
  func.func @transform_2(%arg0: i32, %arg1: memref<8xf32, #tpu.memory_space<smem>>) -> (i32, i32) {
    %c0_i32 = arith.constant 0 : i32
    %c0_i32_0 = arith.constant 0 : i32
    return %arg0, %c0_i32 : i32, i32
  }
}

</mosaic_0001>

<bundles_post_ra>
// kernel: _fourier_forward_impl.1
= control target key start
LH: loop header
LB: loop body
LE: loop exit
PB: predicated region body
PF: predicated region fallthrough
CT: control target
= control target key end

     0   :  { %s541_s15 = smov [#allocation3]   ;;  %s695_s0 = inlined_call_operand.vmem [shape: f32[8], index: 0, kind: input, shape index: {}]   ;;  %s696_s1 = inlined_call_operand.hbm [shape: f32[8,128], index: 1, kind: input, shape index: {}]   ;;  %s697_s2 = inlined_call_operand.vmem [shape: f32[2,8,128], index: 2, kind: output, shape index: {0}]   ;;  %s698_s3 = inlined_call_operand.vmem [shape: f32[8,128], index: 3, kind: output, shape index: {1}]  }
   0x1   :  { %s10_s14 = sshll.u32 %s695_s0, 4  ;;  %s11_s14 = int_to_ptr.vmem [resolvable:$true] %s10_s14 }
   0x2   :  { %13 = dma.vmem_to_smem %s11_s14, 16, %s541_s15, [#allocation2] }
   0x3   :  { %537 = dma.done.wait [#allocation2], 16 }
   0x4   :  { %538 = vsyncadd [#allocation2], 4294967280 }
   0x5   :  { %16 = sfence }
   0x6   :  { %17 = vsyncpa [#allocation5], 0  ;;  %s23_s18 = sshll.u32 %s696_s1, 4  ;;  %s542_s19 = smov [#allocation4]   ;;  %s24_s18 = int_to_ptr.hbm [resolvable:$true] %s23_s18 }
   0x7   :  { %s25_s20 = sshll.u32 %s542_s19, 4  ;;  %s26_s20 = int_to_ptr.vmem [resolvable:$true] %s25_s20 }
   0x8   :  { %28 = dma.hbm_to_vmem [thread:$0]  %s24_s18, 128, %s26_s20, [#allocation5]  }
   0x9   :  { %539 = dma.done.wait [#allocation5], 128  }
   0xa   :  { %540 = vsyncadd [#allocation5], 4294967168  ;;  %v576_v0 = vld [vmem:[#allocation4] sm:$0xff]  ;;  %v543_v13 = vmov 683565275   ;;  %s624_s0 = sld [smem:[#allocation3]] }
   0xb   :  { %v579_v1 = vmul.f32 3.1415927, %v576_v0  ;;  %v544_v15 = vmov 2475754826   ;;  %v545_v17 = vmov 2131351028  }
   0xc   :  { %v546_v19 = vmov 2102212464   ;;  %v547_v21 = vmov 920167782   ;;  %v548_v27 = vmov 1326507024  }
   0xd   :  { %v38_v2 = vand.u32 2139095040, %v579_v1  ;;  %v35_v4 = vand.u32 2147483647, %v579_v1  ;;  %vm37_vm12 = vcmp.lt.s32.totalorder %v579_v1, 0  ;;  %s626_s1 = sld [smem:[#allocation3 + $0x1]] }
   0xe   :  { %s634_s21 = sld [smem:[#allocation3 + $0x2]] }
   0xf   :  { %v39_v3 = vshrl.u32 %v38_v2, 23  ;;  %v42_v7 = vand.u32 8388607, %v35_v4  ;;  %vm36_vm13 = vcmp.le.f32.partialorder %v35_v4, 0.7853982  ;;  %s645_s22 = sld [smem:[#allocation3 + $0x3]] }
  0x10   :  { %s652_s23 = sld [smem:[#allocation3 + $0x4]] }
  0x11   :  { %v478_v5 = vadd.s32 4294967169, %v39_v3  ;;  %v43_v10 = vor.u32 8388608, %v42_v7  ;;  %v549_v3 = vmov 0   ;;  %s660_s24 = sld [smem:[#allocation3 + $0x5]] }
  0x12   :  { %s667_s25 = sld [smem:[#allocation3 + $0x6]] }
  0x13   :  { %v45_v6 = vadd.s32 1, %v478_v5  ;;  %v588_v29 = vshll.u32 %v43_v10, 8  ;;  %s674_s26 = sld [smem:[#allocation3 + $0x7]] }
  0x15   :  { %vm46_vm0 = vcmp.gt.s32.totalorder %v45_v6, 0  ;;  %v84_v41 = vand.u32 65535, %v588_v29  ;;  %v85_v42 = vshrl.u32 %v588_v29, 16 }
  0x16   :  { %v47_v8 = vsel %vm46_vm0, %v45_v6, 0 }
  0x17   :  { %v49_v9 = vand.u32 31, %v47_v8  ;;  %v585_v11 = vshrl.u32 %v47_v8, 5 }
  0x19   :  { %v50_v12 = vsub.s32 32, %v49_v9  ;;  %v52_v14 = vshll.u32 %v543_v13, %v49_v9  ;;  %v55_v16 = vshll.u32 %v544_v15, %v49_v9  ;;  %v58_v18 = vshll.u32 %v545_v17, %v49_v9 }
  0x1a   :  { %v61_v20 = vshll.u32 %v546_v19, %v49_v9  ;;  %v64_v22 = vshll.u32 %v547_v21, %v49_v9  ;;  %vm67_vm1 = vcmp.lt.s32.totalorder %v585_v11, 1  ;;  %vm70_vm2 = vcmp.lt.s32.totalorder %v585_v11, 4 }
  0x1b   :  { %v53_v23 = vshrl.u32 %v544_v15, %v50_v12  ;;  %v56_v24 = vshrl.u32 %v545_v17, %v50_v12  ;;  %v59_v25 = vshrl.u32 %v546_v19, %v50_v12  ;;  %v62_v26 = vshrl.u32 %v547_v21, %v50_v12 }
  0x1c   :  { %v65_v28 = vshrl.u32 %v548_v27, %v50_v12  ;;  %vm69_vm3 = vcmp.lt.s32.totalorder %v585_v11, 3  ;;  %vm68_vm4 = vcmp.lt.s32.totalorder %v585_v11, 2  ;;  %v51_v49 = vshrl.u32 %v543_v13, %v50_v12 }
  0x1d   :  { %v54_v30 = vor.u32 %v53_v23, %v52_v14  ;;  %v57_v31 = vor.u32 %v56_v24, %v55_v16  ;;  %v60_v32 = vor.u32 %v59_v25, %v58_v18  ;;  %v63_v33 = vor.u32 %v62_v26, %v61_v20 }
  0x1e   :  { %v66_v34 = vor.u32 %v65_v28, %v64_v22 }
  0x1f   :  { %v75_v35 = vsel %vm67_vm1, %v54_v30, %v57_v31  ;;  %v79_v36 = vsel %vm67_vm1, %v57_v31, %v60_v32  ;;  %v76_v37 = vsel %vm70_vm2, %v63_v33, 920167782  ;;  %v71_v62 = vsel %vm67_vm1, %v51_v49, %v54_v30 }
  0x20   :  { %v80_v38 = vsel %vm70_vm2, %v66_v34, 1326507024  ;;  %v77_v39 = vsel %vm69_vm3, %v60_v32, %v76_v37  ;;  %v72_v2 = vsel %vm70_vm2, %v60_v32, 2102212464 }
  0x21   :  { %v81_v40 = vsel %vm69_vm3, %v63_v33, %v80_v38  ;;  %v78_v43 = vsel %vm68_vm4, %v75_v35, %v77_v39  ;;  %v73_v14 = vsel %vm69_vm3, %v57_v31, %v72_v2 }
  0x22   :  { %v82_v44 = vsel %vm68_vm4, %v79_v36, %v81_v40  ;;  %v108_v47 = vand.u32 65535, %v78_v43  ;;  %v109_v48 = vshrl.u32 %v78_v43, 16  ;;  %v74_v22 = vsel %vm68_vm4, %v71_v62, %v73_v14 }
  0x23   :  { %v86_v45 = vand.u32 65535, %v82_v44  ;;  %v87_v46 = vshrl.u32 %v82_v44, 16  ;;  %v128_v26 = vmul.u32 %v588_v29, %v74_v22  ;;  %vm178_vm4 = vweird.f32 %v579_v1 }
  0x24   :  { %v110_v53 = vmul.u32 %v108_v47, %v84_v41  ;;  %v111_v54 = vmul.u32 %v109_v48, %v84_v41  ;;  %v112_v55 = vmul.u32 %v108_v47, %v85_v42  ;;  %v113_v59 = vmul.u32 %v109_v48, %v85_v42 }
  0x25   :  { %v88_v50 = vmul.u32 %v86_v45, %v84_v41  ;;  %v89_v51 = vmul.u32 %v87_v46, %v84_v41  ;;  %v90_v52 = vmul.u32 %v86_v45, %v85_v42  ;;  %v91_v56 = vmul.u32 %v87_v46, %v85_v42 }
  0x26   :  { %v114_v60 = vshll.u32 %v111_v54, 16  ;;  %v116_v61 = vshll.u32 %v112_v55, 16  ;;  %v115_v12 = vshrl.u32 %v111_v54, 16  ;;  %v117_v18 = vshrl.u32 %v112_v55, 16 }
  0x27   :  { %v92_v57 = vshll.u32 %v89_v51, 16  ;;  %v94_v58 = vshll.u32 %v90_v52, 16  ;;  %v93_v7 = vshrl.u32 %v89_v51, 16  ;;  %v95_v15 = vshrl.u32 %v90_v52, 16 }
  0x28   :  { %vm118_vm6 = vc.u32 %v110_v53, %v114_v60  ;;  %v120_v6 = vadd.s32 %v114_v60, %v110_v53 }
  0x29   :  { %vm96_vm5 = vc.u32 %v88_v50, %v92_v57  ;;  %v98_v63 = vadd.s32 %v92_v57, %v88_v50  ;;  %v119_v9 = vsel %vm118_vm6, 1, %v549_v3 }
  0x2a   :  { %v97_v5 = vsel %vm96_vm5, 1, %v549_v3  ;;  %v121_v13 = vadd.s32 %v119_v9, %v113_v59  ;;  %vm122_vm8 = vc.u32 %v120_v6, %v116_v61  ;;  %v124_v21 = vadd.s32 %v120_v6, %v116_v61 }
  0x2b   :  { %v99_v8 = vadd.s32 %v97_v5, %v91_v56  ;;  %vm100_vm7 = vc.u32 %v98_v63, %v94_v58  ;;  %v123_v17 = vsel %vm122_vm8, 1, %v549_v3 }
  0x2c   :  { %v101_v10 = vsel %vm100_vm7, 1, %v549_v3  ;;  %v125_v19 = vadd.s32 %v123_v17, %v121_v13 }
  0x2d   :  { %v103_v16 = vadd.s32 %v101_v10, %v99_v8 }
  0x2e   :  { %v126_v23 = vadd.s32 %v125_v19, %v115_v12 }
  0x2f   :  { %v104_v20 = vadd.s32 %v103_v16, %v93_v7 }
  0x30   :  { %v127_v25 = vadd.s32 %v126_v23, %v117_v18  ;;  %v346_v18 = vstv %s624_s0 }
  0x31   :  { %v105_v24 = vadd.s32 %v104_v20, %v95_v15 }
  0x32   :  { %v131_v27 = vadd.s32 1, %v127_v25 }
  0x33   :  { %vm130_vm9 = vc.u32 %v105_v24, %v124_v21  ;;  %v129_v11 = vadd.s32 %v124_v21, %v105_v24 }
  0x34   :  { %v132_v28 = vsel %vm130_vm9, %v131_v27, %v127_v25  ;;  %v358_v27 = vstv %s626_s1 }
  0x35   :  { %v133_v30 = vadd.s32 %v132_v28, %v128_v26 }
  0x37   :  { %v134_v31 = vadd.s32 536870912, %v133_v30 }
  0x39   :  { %v135_v32 = vshrl.u32 %v134_v31, 30 }
  0x3b   :  { %v136_v33 = vshll.u32 %v135_v32, 30  ;;  %v159_v50 = vsub.s32 4, %v135_v32 }
  0x3d   :  { %v137_v34 = vsub.s32 %v133_v30, %v136_v33  ;;  %v160_v53 = vsel %vm37_vm12, %v159_v50, %v135_v32 }
  0x3e   :  { %v162_v56 = vsel %vm36_vm13, 0, %v160_v53 }
  0x3f   :  { %vm138_vm10 = vcmp.lt.s32.totalorder %v137_v34, 0  ;;  %v139_v35 = vsub.s32 0, %v137_v34  ;;  %v179_v61 = vadd.s32 3, %v162_v56  ;;  %v334_v6 = vand.u32 3, %v162_v56 }
  0x41   :  { %v140_v36 = vsel %vm138_vm10, %v139_v35, %v137_v34  ;;  %v180_v5 = vand.u32 3, %v179_v61  ;;  %vm339_vm15 = vcmp.eq.s32.totalorder %v334_v6, 2  ;;  %vm336_vm2 = vcmp.eq.s32.totalorder %v334_v6, 0 }
  0x42   :  { %v141_v37 = vclz %v140_v36  ;;  %vm335_vm3 = vcmp.lt.s32.totalorder %v334_v6, 2  ;;  %v451_v6 = vlaneseq }
  0x43   :  { %vm185_vm14 = vcmp.eq.s32.totalorder %v180_v5, 2  ;;  %vm181_vm0 = vcmp.lt.s32.totalorder %v180_v5, 2  ;;  %vm182_vm1 = vcmp.eq.s32.totalorder %v180_v5, 0 }
  0x44   :  { %v479_v38 = vadd.s32 4294967294, %v141_v37 }
  0x46   :  { %vm480_vm11 = vcmp.lt.s32.totalorder %v479_v38, 0 }
  0x47   :  { %v144_v39 = vsel %vm480_vm11, 0, %v479_v38 }
  0x48   :  { %v145_v40 = vsub.s32 32, %v144_v39  ;;  %v146_v41 = vshll.u32 %v137_v34, %v144_v39  ;;  %v149_v42 = vsub.s32 4294967266, %v144_v39 }
  0x4a   :  { %v147_v29 = vshrl.u32 %v129_v11, %v145_v40  ;;  %v150_v43 = vadd.s32 127, %v149_v42  ;;  %v372_v40 = vstv %s634_s21 }
  0x4c   :  { %v148_v44 = vor.u32 %v147_v29, %v146_v41  ;;  %v151_v45 = vshll.u32 %v150_v43, 23 }
  0x4e   :  { %v152_v46 = vor.u32 4788187, %v151_v45  ;;  %v155_v47 = vcvt.s32.f32 %v148_v44 }
  0x50   :  { %v153_v48 = vand.u32 2147483647, %v152_v46 }
  0x52   :  { %v156_v49 = vmul.f32 %v155_v47, %v153_v48 }
  0x54   :  { %v157_v51 = vxor.u32 2147483648, %v156_v49 }
  0x56   :  { %v158_v52 = vsel %vm37_vm12, %v157_v51, %v156_v49  ;;  %v386_v49 = vstv %s645_s22 }
  0x57   :  { %v161_v54 = vsel %vm36_vm13, %v579_v1, %v158_v52 }
  0x58   :  { %v163_v55 = vmul.f32 %v161_v54, %v161_v54 }
  0x5a   :  { %v164_v57 = vmul.f32 -0.001358992, %v163_v55  ;;  %v171_v58 = vmul.f32 -0.00019511016, %v163_v55 }
  0x5c   :  { %v165_v59 = vadd.f32 0.041655596, %v164_v57  ;;  %v172_v60 = vadd.f32 0.008332121, %v171_v58 }
  0x5e   :  { %v166_v62 = vmul.f32 %v165_v59, %v163_v55  ;;  %v173_v63 = vmul.f32 %v172_v60, %v163_v55 }
  0x60   :  { %v167_v2 = vadd.f32 -0.4999988, %v166_v62  ;;  %v174_v3 = vadd.f32 -0.16666654, %v173_v63 }
  0x62   :  { %v168_v7 = vmul.f32 %v167_v2, %v163_v55  ;;  %v175_v4 = vmul.f32 %v174_v3, %v163_v55 }
  0x64   :  { %v169_v8 = vadd.f32 1.0, %v168_v7  ;;  %v176_v9 = vadd.f32 1.0, %v175_v4 }
  0x66   :  { %v177_v10 = vmul.f32 %v176_v9, %v161_v54  ;;  %v186_v12 = vxor.u32 2147483648, %v169_v8  ;;  %v400_v54 = vstv %s652_s23 }
  0x68   :  { %v183_v13 = vxor.u32 2147483648, %v177_v10  ;;  %v187_v14 = vsel %vm185_vm14, %v186_v12, %v177_v10  ;;  %v341_v15 = vsel %vm339_vm15, %v186_v12, %v177_v10 }
  0x6a   :  { %v184_v16 = vsel %vm182_vm1, %v169_v8, %v183_v13  ;;  %v338_v17 = vsel %vm336_vm2, %v169_v8, %v183_v13 }
  0x6b   :  { %v188_v19 = vsel %vm181_vm0, %v184_v16, %v187_v14  ;;  %v342_v20 = vsel %vm335_vm3, %v338_v17, %v341_v15  ;;  %v414_v15 = vstv %s660_s24 }
  0x6c   :  { %v630_v21 = vsel %vm178_vm4, nan, %v188_v19  ;;  %v632_v22 = vsel %vm178_vm4, nan, %v342_v20 }
  0x6d   :  { %v347_v23 = vmul.f32 %v346_v18, %v630_v21  ;;  %v351_v24 = vmul.f32 %v632_v22, %v630_v21  ;;  %v353_v25 = vmul.f32 %v632_v22, %v632_v22  ;;  %v354_v1 = vmul.f32 %v630_v21, %v630_v21 }
  0x6e   :  { %v344_v28 = vmul.f32 3.1415927, %v632_v22 }
  0x6f   :  { %v352_v26 = vadd.f32 %v351_v24, %v351_v24  ;;  %v355_v30 = vsub.f32 %v353_v25, %v354_v1  ;;  %v348_v31 = vadd.f32 %v347_v23, %v576_v0  ;;  %v452_v23 = vshrl.u32 %v451_v6, 7 }
  0x70   :  { %v349_v34 = vmul.f32 %v346_v18, %v344_v28 }
  0x71   :  { %v365_v32 = vmul.f32 %v352_v26, %v632_v22  ;;  %v368_v33 = vmul.f32 %v352_v26, %v630_v21  ;;  %v359_v35 = vmul.f32 %v358_v27, %v352_v26  ;;  %v364_v36 = vmul.f32 %v355_v30, %v630_v21 }
  0x72   :  { %v367_v37 = vmul.f32 %v355_v30, %v632_v22  ;;  %v356_v38 = vmul.f32 6.2831855, %v355_v30  ;;  %v350_v41 = vadd.f32 1.0, %v349_v34  ;;  %v454_v34 = vand.u32 127, %v451_v6 }
  0x73   :  { %v366_v11 = vadd.f32 %v365_v32, %v364_v36  ;;  %v360_v0 = vadd.f32 %v359_v35, %v348_v31 }
  0x74   :  { %v369_v39 = vsub.f32 %v367_v37, %v368_v33  ;;  %v361_v42 = vmul.f32 %v358_v27, %v356_v38  ;;  %v363_v47 = vmin.f32 %v344_v28, %v356_v38  ;;  %v428_v33 = vstv %s667_s25 }
  0x75   :  { %v373_v43 = vmul.f32 %v372_v40, %v366_v11  ;;  %v379_v44 = vmul.f32 %v366_v11, %v632_v22  ;;  %v382_v46 = vmul.f32 %v366_v11, %v630_v21  ;;  %v458_v38 = vmul.u32 128, %v452_v23 }
  0x76   :  { %v378_v29 = vmul.f32 %v369_v39, %v630_v21  ;;  %v381_v45 = vmul.f32 %v369_v39, %v632_v22  ;;  %v370_v48 = vmul.f32 9.424778, %v369_v39  ;;  %v362_v52 = vadd.f32 %v361_v42, %v350_v41 }
  0x77   :  { %v374_v55 = vadd.f32 %v373_v43, %v360_v0 }
  0x78   :  { %v380_v50 = vadd.f32 %v379_v44, %v378_v29  ;;  %v383_v51 = vsub.f32 %v381_v45, %v382_v46  ;;  %v375_v53 = vmul.f32 %v372_v40, %v370_v48  ;;  %v377_v59 = vmin.f32 %v363_v47, %v370_v48 }
  0x79   :  { %v442_v44 = vstv %s674_s26  ;;  %v459_v48 = vadd.s32 %v458_v38, %v454_v34 }
  0x7a   :  { %v387_v56 = vmul.f32 %v386_v49, %v380_v50  ;;  %v392_v57 = vmul.f32 %v383_v51, %v630_v21  ;;  %v393_v58 = vmul.f32 %v380_v50, %v632_v22  ;;  %v384_v60 = vmul.f32 12.566371, %v383_v51 }
  0x7b   :  { %v395_v61 = vmul.f32 %v383_v51, %v632_v22  ;;  %v396_v62 = vmul.f32 %v380_v50, %v630_v21  ;;  %v376_v2 = vadd.f32 %v375_v53, %v362_v52  ;;  %vm460_vm5 = vcmp.lt.s32.totalorder %v459_v48, 1024 }
  0x7c   :  { %v394_v63 = vadd.f32 %v393_v58, %v392_v57  ;;  %v389_v3 = vmul.f32 %v386_v49, %v384_v60  ;;  %v388_v7 = vadd.f32 %v387_v56, %v374_v55  ;;  %v391_v10 = vmin.f32 %v377_v59, %v384_v60 }
  0x7d   :  { %v397_v5 = vsub.f32 %v395_v61, %v396_v62 }
  0x7e   :  { %v401_v4 = vmul.f32 %v400_v54, %v394_v63  ;;  %v407_v8 = vmul.f32 %v394_v63, %v632_v22  ;;  %v410_v9 = vmul.f32 %v394_v63, %v630_v21  ;;  %v390_v16 = vadd.f32 %v389_v3, %v376_v2 }
  0x7f   :  { %v398_v12 = vmul.f32 15.707963, %v397_v5  ;;  %v406_v13 = vmul.f32 %v397_v5, %v630_v21  ;;  %v409_v14 = vmul.f32 %v397_v5, %v632_v22 }
  0x80   :  { %v402_v20 = vadd.f32 %v401_v4, %v388_v7 }
  0x81   :  { %v403_v17 = vmul.f32 %v400_v54, %v398_v12  ;;  %v408_v18 = vadd.f32 %v407_v8, %v406_v13  ;;  %v411_v19 = vsub.f32 %v409_v14, %v410_v9  ;;  %v405_v24 = vmin.f32 %v391_v10, %v398_v12 }
  0x83   :  { %v412_v25 = vmul.f32 18.849556, %v411_v19  ;;  %v415_v1 = vmul.f32 %v414_v15, %v408_v18  ;;  %v420_v26 = vmul.f32 %v411_v19, %v630_v21  ;;  %v421_v27 = vmul.f32 %v408_v18, %v632_v22 }
  0x84   :  { %v423_v28 = vmul.f32 %v411_v19, %v632_v22  ;;  %v424_v30 = vmul.f32 %v408_v18, %v630_v21  ;;  %v404_v31 = vadd.f32 %v403_v17, %v390_v16 }
  0x85   :  { %v417_v32 = vmul.f32 %v414_v15, %v412_v25  ;;  %v416_v35 = vadd.f32 %v415_v1, %v402_v20  ;;  %v422_v36 = vadd.f32 %v421_v27, %v420_v26  ;;  %v419_v11 = vmin.f32 %v405_v24, %v412_v25 }
  0x86   :  { %v425_v37 = vsub.f32 %v423_v28, %v424_v30 }
  0x87   :  { %v429_v40 = vmul.f32 %v428_v33, %v422_v36  ;;  %v435_v0 = vmul.f32 %v422_v36, %v632_v22  ;;  %v418_v42 = vadd.f32 %v417_v32, %v404_v31  ;;  %v438_v43 = vmul.f32 %v422_v36, %v630_v21 }
  0x88   :  { %v426_v39 = vmul.f32 21.991148, %v425_v37  ;;  %v434_v41 = vmul.f32 %v425_v37, %v630_v21  ;;  %v437_v29 = vmul.f32 %v425_v37, %v632_v22 }
  0x89   :  { %v430_v45 = vadd.f32 %v429_v40, %v416_v35 }
  0x8a   :  { %v431_v46 = vmul.f32 %v428_v33, %v426_v39  ;;  %v436_v47 = vadd.f32 %v435_v0, %v434_v41  ;;  %v433_v49 = vmin.f32 %v419_v11, %v426_v39  ;;  %v439_v50 = vsub.f32 %v437_v29, %v438_v43 }
  0x8c   :  { %v443_v51 = vmul.f32 %v442_v44, %v436_v47  ;;  %v432_v52 = vadd.f32 %v431_v46, %v418_v42  ;;  %v440_v53 = vmul.f32 25.132742, %v439_v50 }
  0x8e   :  { %v444_v54 = vadd.f32 %v443_v51, %v430_v45  ;;  %v445_v55 = vmul.f32 %v442_v44, %v440_v53  ;;  %v447_v56 = vmin.f32 %v433_v49, %v440_v53 }
  0x90   :  { %448 = vst [vmem:[%s697_s2] sm:$0xff] %v444_v54  ;;  %v446_v22 = vadd.f32 %v445_v55, %v432_v52  ;;  %v461_v21 = vsel %vm460_vm5, %v447_v56, inf }
  0x91   :  { %v462_v57 = vrot.slane %v461_v21, 4 }
  0x92   :  { %491 = vst [vmem:[%s697_s2 + $0x8] sm:$0xff] %v446_v22 }
  0x93   :  { %v463_v58 = vmin.f32 %v461_v21, %v462_v57 }
  0x95   :  { %v464_v59 = vrot.slane %v463_v58, 2 }
  0x97   :  { %v465_v60 = vmin.f32 %v463_v58, %v464_v59 }
  0x99   :  { %v466_v61 = vrot.slane %v465_v60, 1 }
  0x9b   :  { %v467_v62 = vmin.f32 %v465_v60, %v466_v61 }
  0x9d   :  { %468 = vst [vmem:[%s698_s3] sm:$0xff] %v467_v62 }
  0x9e   :  { %477 = vsyncpa [#allocation5], 1 }

</bundles_post_ra>
